<compile_context>
chip_gen: v5e
topology: v5e:2x2
jax: 0.10.0
libtpu: 0.0.40
codegen_flags: <defaults>
</compile_context>

<pallas_src>
import functools

import jax
import jax.numpy as jnp
from jax import lax
from jax.experimental import pallas as pl
from jax.experimental.pallas import tpu as pltpu

_CUBIC_A = -0.75  # PyTorch bicubic convolution coefficient


def _cubic_weight(s):
    s = jnp.abs(s)
    A = _CUBIC_A
    poly1 = ((A + 2.0) * s - (A + 3.0)) * s * s + 1.0          # |s| <= 1
    poly2 = ((A * s - 5.0 * A) * s + 8.0 * A) * s - 4.0 * A    # 1 < |s| < 2
    return jnp.where(s <= 1.0, poly1, jnp.where(s < 2.0, poly2, 0.0))


def _bicubic_resize_matrix(in_size: int, out_size: int) -> jnp.ndarray:
    """(out_size, in_size) matrix M so M @ v == 1-D PyTorch bicubic resize of v
    (align_corners=False, border taps clamped/replicated)."""
    scale = in_size / out_size
    i = jnp.arange(out_size, dtype=jnp.float32)
    center = (i + 0.5) * scale - 0.5
    x0 = jnp.floor(center)
    t = center - x0
    w = jnp.stack(
        [_cubic_weight(t + 1.0), _cubic_weight(t),
         _cubic_weight(1.0 - t), _cubic_weight(2.0 - t)], axis=-1)          # (out, 4)
    idx = x0[:, None].astype(jnp.int32) + jnp.arange(-1, 3, dtype=jnp.int32)
    idx = jnp.clip(idx, 0, in_size - 1)                                     # (out, 4)
    onehot = (idx[:, :, None] == jnp.arange(in_size, dtype=jnp.int32)[None, None, :])
    return jnp.sum(w[:, :, None] * onehot.astype(jnp.float32), axis=1)      # (out, in)


def _padded_weights(H: int, W: int, max_size: int):
    """f32 separable resize matrices, zero-extended so padding is folded in."""
    scale = max_size / float(max(H, W))
    new_h, new_w = (round(d * scale) for d in (H, W))
    ph0 = (max_size - new_h) // 2
    pw0 = (max_size - new_w) // 2
    wh = jnp.zeros((max_size, H), jnp.float32).at[ph0:ph0 + new_h, :].set(
        _bicubic_resize_matrix(H, new_h))                                   # (ms, H)
    wwT = jnp.zeros((W, max_size), jnp.float32).at[:, pw0:pw0 + new_w].set(
        _bicubic_resize_matrix(W, new_w).T)                                 # (W, ms)
    return wh, wwT, ph0, new_h, pw0, new_w


def _resize_pad_kernel(wh_ref, wwT_ref, x_ref, o_ref, *scratch, fill, ph0, new_h,
                       pw0, new_w, w_first, fold, tiled_k):
    """Separable bicubic resize + pad for a (1, cb, H(, or K-slice), W) block.

    Both passes run on the MXU in bf16 with f32 accumulation.  Padding comes
    out as exact zeros from the zero-extended weight matrices; a nonzero fill
    is applied with a mask built once per grid step.  When tiled_k, the first
    pass accumulates into an f32 VMEM scratch across the K grid axis.
    """
    acc_ref = scratch[0] if tiled_k else None
    cb = x_ref.shape[1]
    ms = o_ref.shape[-1]

    inside = None
    if fill != 0.0:                     # static python branch; tiny (ms x ms)
        row = lax.broadcasted_iota(jnp.int32, (ms, 1), 0)
        col = lax.broadcasted_iota(jnp.int32, (1, ms), 1)
        inside = (((row >= ph0) & (row < ph0 + new_h)) &
                  ((col >= pw0) & (col < pw0 + new_w)))

    def finalize(c, core_f32):
        if inside is not None:
            core_f32 = jnp.where(inside, core_f32, jnp.float32(fill))
        o_ref[0, c] = core_f32.astype(o_ref.dtype)

    wh = wh_ref[...]                    # (ms, H) or (ms, tk)   bf16
    wwT = wwT_ref[...]                  # (W, ms) or (tk, ms)   bf16
    x = x_ref[0].astype(jnp.bfloat16)   # (cb, H, Wb) or (cb, Hb, W)

    if w_first:
        # ---- contract W (or a K-slice of it) first ----
        Hfull = x.shape[1]

        def second_pass(t16):           # t16: (cb, Hfull, ms) bf16
            for c in range(cb):
                finalize(c, jnp.dot(wh, t16[c], preferred_element_type=jnp.float32))

        if tiled_k:
            k = pl.program_id(2)

            @pl.when(k == 0)
            def _():
                acc_ref[...] = jnp.zeros_like(acc_ref)

            if fold:
                part = jnp.dot(x.reshape(cb * Hfull, x.shape[2]), wwT,
                               preferred_element_type=jnp.float32)
                acc_ref[...] += part.reshape(cb, Hfull, ms)
            else:
                for c in range(cb):
                    acc_ref[c] += jnp.dot(x[c], wwT,
                                          preferred_element_type=jnp.float32)

            @pl.when(k == pl.num_programs(2) - 1)
            def _():
                second_pass(acc_ref[...].astype(jnp.bfloat16))
        else:
            if fold:
                t = jnp.dot(x.reshape(cb * Hfull, x.shape[2]), wwT,
                            preferred_element_type=jnp.float32)        # (cb*H, ms)
                second_pass(t.astype(jnp.bfloat16).reshape(cb, Hfull, ms))
            else:
                # TODO(synk): could lane-batch this second pass on v5e; rare
                # path now that fold only needs H % 16 == 0.
                for c in range(cb):
                    t = jnp.dot(x[c], wwT, preferred_element_type=jnp.float32)
                    finalize(c, jnp.dot(wh, t.astype(jnp.bfloat16),
                                        preferred_element_type=jnp.float32))
    else:
        # ---- contract H (or a K-slice of it) first ----
        Wfull = x.shape[2]

        def second_pass(t16):           # t16: (cb, ms, Wfull) bf16
            if cb > 1 and ms % 16 == 0:
                # Batched across channels: one (cb*ms, W) @ (W, ms) MXU issue.
                out = jnp.dot(t16.reshape(cb * ms, Wfull), wwT,
                              preferred_element_type=jnp.float32)
                out = out.reshape(cb, ms, ms)
                for c in range(cb):
                    finalize(c, out[c])
            else:
                for c in range(cb):
                    finalize(c, jnp.dot(t16[c], wwT,
                                        preferred_element_type=jnp.float32))

        if tiled_k:
            k = pl.program_id(2)

            @pl.when(k == 0)
            def _():
                acc_ref[...] = jnp.zeros_like(acc_ref)

            for c in range(cb):
                acc_ref[c] += jnp.dot(wh, x[c], preferred_element_type=jnp.float32)

            @pl.when(k == pl.num_programs(2) - 1)
            def _():
                second_pass(acc_ref[...].astype(jnp.bfloat16))
        else:
            parts = [jnp.dot(wh, x[c], preferred_element_type=jnp.float32
                             ).astype(jnp.bfloat16) for c in range(cb)]
            t16 = parts[0][None] if cb == 1 else jnp.stack(parts, axis=0)
            second_pass(t16)


def resize_max_size(img: jnp.ndarray, max_size: int, fill: float = 0.0,
                    *, _force_tk=None) -> jnp.ndarray:
    """Pallas implementation of ResizeMaxSize.forward for an NCHW tensor.

    `_force_tk` is a test hook that forces contraction-dim tiling with the
    given tile (must be a multiple of 128 that divides the contraction dim).
    """
    N, C, H, W = img.shape
    scale = max_size / float(max(H, W))
    if scale == 1.0:
        return img  # reference module returns the input unchanged

    ms = int(max_size)
    wh32, wwT32, ph0, new_h, pw0, new_w = _padded_weights(H, W, ms)
    wh = wh32.astype(jnp.bfloat16)       # zero rows stay exactly zero in bf16
    wwT = wwT32.astype(jnp.bfloat16)

    w_first = H <= W                     # contract the larger spatial dim first
    K = W if w_first else H              # contraction dim of the first pass
    in_item = jnp.dtype(img.dtype).itemsize
    out_item = in_item
    # Channel-fold merge (cb,H,Wb)->(cb*H,Wb) happens after the in-kernel bf16
    # cast, so it is layout-free whenever H is a multiple of 16.
    fold = (H % 16 == 0)

    # ---- generation-aware VMEM budget ----
    try:
        vmem_cap = int(pltpu.get_tpu_info().vmem_capacity_bytes)
    except Exception:
        vmem_cap = 64 * 1024 * 1024      # conservative fallback (v7x per-core)
    budget = int(0.65 * vmem_cap)

    def step_bytes(cb_, tk_):
        tiled = tk_ != K
        if w_first:
            x_el = cb_ * H * tk_
            wk = tk_ * ms * 2 * (2 if tiled else 1)    # K-sliced weight (wwT)
            wc = ms * H * 2                            # constant weight (wh), 1 buf
            acc_el = cb_ * H * ms
        else:
            x_el = cb_ * tk_ * W
            wk = ms * tk_ * 2 * (2 if tiled else 1)    # K-sliced weight (wh)
            wc = W * ms * 2                            # constant weight (wwT), 1 buf
            acc_el = cb_ * ms * W
        return (2 * x_el * in_item                     # input block (dbl-buffered)
                + x_el * 2                             # in-kernel bf16 copy
                + 2 * cb_ * ms * ms * out_item         # output block (dbl-buffered)
                + wk + wc
                + acc_el * 4 + acc_el * 2              # f32 intermediate + bf16 cast
                + cb_ * ms * ms * 4)                   # second-pass f32 result

    # Channel-block candidates; keep >= 2 grid steps on the parallel axes when
    # possible so both v7x TensorCores get work.
    divisors = [d for d in range(C, 0, -1) if C % d == 0]
    par_ok = [d for d in divisors if N * (C // d) >= 2]
    cb_list = par_ok if par_ok else divisors

    cb, tk, tiled_k = None, K, False
    for d in cb_list:                                  # 1) untiled, biggest fitting cb
        if step_bytes(d, K) <= budget:
            cb = d
            break
    if cb is None:                                     # 2) tile the contraction dim
        if K % 128 == 0 and K >= 256:
            tiled_k = True
            cb, tk = 1, 128
            done = False
            for d in cb_list:
                for cand in (1024, 512, 256, 128):
                    if K % cand == 0 and cand < K and step_bytes(d, cand) <= budget:
                        cb, tk, done = d, cand, True
                        break
                if done:
                    break
        else:
            # TODO(synk): non-128-divisible huge contraction dims are not tiled.
            cb, tk = 1, K

    if _force_tk is not None and _force_tk < K and K % int(_force_tk) == 0:
        tiled_k, tk = True, int(_force_tk)             # test hook
        if cb is None:
            cb = 1

    nk = (K // tk) if tiled_k else 1
    est = step_bytes(cb, tk)
    vmem_limit = int(min(int(0.9 * vmem_cap), max(48 * 1024 * 1024, int(1.5 * est))))
    vmem_limit = int(min(vmem_cap, max(vmem_limit, est + (4 << 20))))

    kernel = functools.partial(
        _resize_pad_kernel, fill=float(fill), ph0=ph0, new_h=new_h, pw0=pw0,
        new_w=new_w, w_first=w_first, fold=fold, tiled_k=tiled_k)

    scratch_shapes = []
    if tiled_k:
        scratch_shapes.append(
            pltpu.VMEM((cb, H, ms) if w_first else (cb, ms, W), jnp.float32))

    def build(use_buffered):
        const_kw = dict(pipeline_mode=pl.Buffered(1)) if use_buffered else {}
        if w_first:
            wh_spec = pl.BlockSpec((ms, H), lambda n, c, k: (0, 0), **const_kw)
            if tiled_k:
                wwT_spec = pl.BlockSpec((tk, ms), lambda n, c, k: (k, 0))
                x_spec = pl.BlockSpec((1, cb, H, tk), lambda n, c, k: (n, c, 0, k))
            else:
                wwT_spec = pl.BlockSpec((W, ms), lambda n, c, k: (0, 0), **const_kw)
                x_spec = pl.BlockSpec((1, cb, H, W), lambda n, c, k: (n, c, 0, 0))
        else:
            wwT_spec = pl.BlockSpec((W, ms), lambda n, c, k: (0, 0), **const_kw)
            if tiled_k:
                wh_spec = pl.BlockSpec((ms, tk), lambda n, c, k: (0, k))
                x_spec = pl.BlockSpec((1, cb, tk, W), lambda n, c, k: (n, c, k, 0))
            else:
                wh_spec = pl.BlockSpec((ms, H), lambda n, c, k: (0, 0), **const_kw)
                x_spec = pl.BlockSpec((1, cb, H, W), lambda n, c, k: (n, c, 0, 0))
        out_spec = pl.BlockSpec((1, cb, ms, ms), lambda n, c, k: (n, c, 0, 0))
        return pl.pallas_call(
            kernel,
            out_shape=jax.ShapeDtypeStruct((N, C, ms, ms), img.dtype),
            grid=(N, C // cb, nk),
            in_specs=[wh_spec, wwT_spec, x_spec],
            out_specs=out_spec,
            scratch_shapes=tuple(scratch_shapes),
            compiler_params=pltpu.CompilerParams(
                dimension_semantics=("parallel", "parallel", "arbitrary"),
                vmem_limit_bytes=vmem_limit),
        )

    try:
        return build(True)(wh, wwT, img)
    except Exception:
        # Fallback if Buffered(1) weight specs are rejected by this JAX/Mosaic.
        return build(False)(wh, wwT, img)


if __name__ == "__main__":
    key = jax.random.PRNGKey(0)

    # Test 1: portrait (H > W) -> H-first order, channel-batched second pass.
    # 32x24 -> resize (16, 12), pad to (16, 16) with 2 zero columns each side.
    x = jax.random.uniform(key, (2, 4, 32, 24), dtype=jnp.float32)
    out = jax.block_until_ready(resize_max_size(x, max_size=16, fill=0.0))
    assert out.shape == (2, 4, 16, 16), out.shape
    assert out.dtype == x.dtype
    assert float(jnp.max(jnp.abs(out[..., :, :2]))) == 0.0       # left pad cols
    assert float(jnp.max(jnp.abs(out[..., :, -2:]))) == 0.0      # right pad cols
    wh32, wwT32, *_ = _padded_weights(32, 24, 16)
    ref = jnp.einsum('sh,nchw,wt->ncst', wh32, x, wwT32)         # f32 reference
    assert float(jnp.max(jnp.abs(out - ref))) < 0.1              # bf16 MXU tolerance

    # Test 2: landscape (H < W) -> W-first order with channel fold, nonzero fill.
    # 16x24 -> resize (5, 8), pad rows to 8 with fill=0.5.
    x2 = jax.random.uniform(jax.random.PRNGKey(1), (2, 3, 16, 24), dtype=jnp.float32)
    out2 = jax.block_until_ready(resize_max_size(x2, max_size=8, fill=0.5))
    assert out2.shape == (2, 3, 8, 8), out2.shape
    wh32b, wwT32b, ph0b, new_hb, pw0b, new_wb = _padded_weights(16, 24, 8)
    assert float(jnp.max(jnp.abs(out2[..., 0, :] - 0.5))) == 0.0   # top pad row
    assert float(jnp.max(jnp.abs(out2[..., -1, :] - 0.5))) == 0.0  # bottom pad row
    core2 = jnp.einsum('sh,nchw,wt->ncst', wh32b, x2, wwT32b)
    rr = jnp.arange(8)[:, None]
    cc = jnp.arange(8)[None, :]
    inside2 = ((rr >= ph0b) & (rr < ph0b + new_hb) &
               (cc >= pw0b) & (cc < pw0b + new_wb))
    ref2 = jnp.where(inside2, core2, 0.5)
    assert float(jnp.max(jnp.abs(out2 - ref2))) < 0.1

    # Test 3: forced contraction-dim tiling on the W-first (fold) path.
    x3 = jax.random.uniform(jax.random.PRNGKey(2), (1, 3, 128, 256), dtype=jnp.float32)
    out3 = jax.block_until_ready(resize_max_size(x3, max_size=64, fill=0.0,
                                                 _force_tk=128))
    assert out3.shape == (1, 3, 64, 64), out3.shape
    wh32c, wwT32c, *_ = _padded_weights(128, 256, 64)
    ref3 = jnp.einsum('sh,nchw,wt->ncst', wh32c, x3, wwT32c)
    assert float(jnp.max(jnp.abs(out3 - ref3))) < 0.1

    # Test 4: forced contraction-dim tiling on the H-first path.
    x4 = jax.random.uniform(jax.random.PRNGKey(3), (1, 2, 256, 128), dtype=jnp.float32)
    out4 = jax.block_until_ready(resize_max_size(x4, max_size=64, fill=0.0,
                                                 _force_tk=128))
    assert out4.shape == (1, 2, 64, 64), out4.shape
    wh32d, wwT32d, *_ = _padded_weights(256, 128, 64)
    ref4 = jnp.einsum('sh,nchw,wt->ncst', wh32d, x4, wwT32d)
    assert float(jnp.max(jnp.abs(out4 - ref4))) < 0.1

    print("KERNEL_OK")
</pallas_src>

<mosaic_0001>
module attributes {stable_mosaic.version = 11 : i64} {
  func.func @_resize_pad_kernel(%arg0: i32, %arg1: i32, %arg2: i32, %arg3: memref<16x32xbf16, #tpu.memory_space<vmem>>, %arg4: memref<24x16xbf16, #tpu.memory_space<vmem>>, %arg5: memref<1x4x32x24xf32, #tpu.memory_space<vmem>>, %arg6: memref<1x4x16x16xf32, #tpu.memory_space<vmem>>) attributes {dimension_semantics = [#tpu.dimension_semantics<parallel>, #tpu.dimension_semantics<parallel>, #tpu.dimension_semantics<arbitrary>], iteration_bounds = array<i64: 2, 1, 1>, scalar_prefetch = 0 : i64, scratch_operands = 0 : i64, tpu.core_type = #tpu.core_type<tc>, window_params = [{pipeline_mode = #tpu.pipeline_mode<synchronous>, transform_indices = @transform_0, window_bounds = array<i64: 16, 32>}, {pipeline_mode = #tpu.pipeline_mode<synchronous>, transform_indices = @transform_1, window_bounds = array<i64: 24, 16>}, {transform_indices = @transform_2, window_bounds = array<i64: 1, 4, 32, 24>}, {transform_indices = @transform_3, window_bounds = array<i64: 1, 4, 16, 16>}]} {
    %c0 = arith.constant 0 : index
    %c0_0 = arith.constant 0 : index
    %0 = vector.load %arg3[%c0, %c0_0] : memref<16x32xbf16, #tpu.memory_space<vmem>>, vector<16x32xbf16>
    %c0_1 = arith.constant 0 : index
    %c0_2 = arith.constant 0 : index
    %1 = vector.load %arg4[%c0_1, %c0_2] : memref<24x16xbf16, #tpu.memory_space<vmem>>, vector<24x16xbf16>
    %c0_3 = arith.constant 0 : index
    %c0_4 = arith.constant 0 : index
    %c0_5 = arith.constant 0 : index
    %c0_6 = arith.constant 0 : index
    %2 = vector.load %arg5[%c0_3, %c0_4, %c0_5, %c0_6] : memref<1x4x32x24xf32, #tpu.memory_space<vmem>>, vector<1x4x32x24xf32>
    %3 = vector.shape_cast %2 : vector<1x4x32x24xf32> to vector<4x32x24xf32>
    %4 = arith.truncf %3 : vector<4x32x24xf32> to vector<4x32x24xbf16>
    %5 = vector.extract_strided_slice %4 {offsets = [0, 0, 0], sizes = [1, 32, 24], strides = [1, 1, 1]} : vector<4x32x24xbf16> to vector<1x32x24xbf16>
    %6 = vector.shape_cast %5 : vector<1x32x24xbf16> to vector<32x24xbf16>
    %cst = arith.constant dense<0.000000e+00> : vector<16x24xf32>
    %7 = tpu.matmul %0, %6, %cst {dimension_numbers = #tpu.dot_dimension_numbers<[1], [0], [0], [1], [0, 0, 1, 1], [], []>} : vector<16x32xbf16>, vector<32x24xbf16>, vector<16x24xf32> -> vector<16x24xf32>
    %8 = arith.truncf %7 : vector<16x24xf32> to vector<16x24xbf16>
    %9 = vector.extract_strided_slice %4 {offsets = [1, 0, 0], sizes = [1, 32, 24], strides = [1, 1, 1]} : vector<4x32x24xbf16> to vector<1x32x24xbf16>
    %10 = vector.shape_cast %9 : vector<1x32x24xbf16> to vector<32x24xbf16>
    %cst_7 = arith.constant dense<0.000000e+00> : vector<16x24xf32>
    %11 = tpu.matmul %0, %10, %cst_7 {dimension_numbers = #tpu.dot_dimension_numbers<[1], [0], [0], [1], [0, 0, 1, 1], [], []>} : vector<16x32xbf16>, vector<32x24xbf16>, vector<16x24xf32> -> vector<16x24xf32>
    %12 = arith.truncf %11 : vector<16x24xf32> to vector<16x24xbf16>
    %13 = vector.extract_strided_slice %4 {offsets = [2, 0, 0], sizes = [1, 32, 24], strides = [1, 1, 1]} : vector<4x32x24xbf16> to vector<1x32x24xbf16>
    %14 = vector.shape_cast %13 : vector<1x32x24xbf16> to vector<32x24xbf16>
    %cst_8 = arith.constant dense<0.000000e+00> : vector<16x24xf32>
    %15 = tpu.matmul %0, %14, %cst_8 {dimension_numbers = #tpu.dot_dimension_numbers<[1], [0], [0], [1], [0, 0, 1, 1], [], []>} : vector<16x32xbf16>, vector<32x24xbf16>, vector<16x24xf32> -> vector<16x24xf32>
    %16 = arith.truncf %15 : vector<16x24xf32> to vector<16x24xbf16>
    %17 = vector.extract_strided_slice %4 {offsets = [3, 0, 0], sizes = [1, 32, 24], strides = [1, 1, 1]} : vector<4x32x24xbf16> to vector<1x32x24xbf16>
    %18 = vector.shape_cast %17 : vector<1x32x24xbf16> to vector<32x24xbf16>
    %cst_9 = arith.constant dense<0.000000e+00> : vector<16x24xf32>
    %19 = tpu.matmul %0, %18, %cst_9 {dimension_numbers = #tpu.dot_dimension_numbers<[1], [0], [0], [1], [0, 0, 1, 1], [], []>} : vector<16x32xbf16>, vector<32x24xbf16>, vector<16x24xf32> -> vector<16x24xf32>
    %20 = arith.truncf %19 : vector<16x24xf32> to vector<16x24xbf16>
    %21 = vector.shape_cast %8 : vector<16x24xbf16> to vector<1x16x24xbf16>
    %22 = vector.shape_cast %12 : vector<16x24xbf16> to vector<1x16x24xbf16>
    %23 = vector.shape_cast %16 : vector<16x24xbf16> to vector<1x16x24xbf16>
    %24 = vector.shape_cast %20 : vector<16x24xbf16> to vector<1x16x24xbf16>
    %25 = tpu.concatenate %21, %22, %23, %24 in 0 : vector<1x16x24xbf16>, vector<1x16x24xbf16>, vector<1x16x24xbf16>, vector<1x16x24xbf16> -> vector<4x16x24xbf16>
    %26 = vector.shape_cast %25 : vector<4x16x24xbf16> to vector<64x24xbf16>
    %cst_10 = arith.constant dense<0.000000e+00> : vector<64x16xf32>
    %27 = tpu.matmul %26, %1, %cst_10 {dimension_numbers = #tpu.dot_dimension_numbers<[1], [0], [0], [1], [0, 0, 1, 1], [], []>} : vector<64x24xbf16>, vector<24x16xbf16>, vector<64x16xf32> -> vector<64x16xf32>
    %28 = vector.shape_cast %27 : vector<64x16xf32> to vector<4x16x16xf32>
    %29 = vector.extract_strided_slice %28 {offsets = [0, 0, 0], sizes = [1, 16, 16], strides = [1, 1, 1]} : vector<4x16x16xf32> to vector<1x16x16xf32>
    %30 = vector.shape_cast %29 : vector<1x16x16xf32> to vector<16x16xf32>
    %c0_11 = arith.constant 0 : index
    %c0_12 = arith.constant 0 : index
    %c0_13 = arith.constant 0 : index
    %c0_14 = arith.constant 0 : index
    %31 = vector.load %arg6[%c0_11, %c0_12, %c0_13, %c0_14] : memref<1x4x16x16xf32, #tpu.memory_space<vmem>>, vector<1x1x16x16xf32>
    %32 = vector.shape_cast %31 : vector<1x1x16x16xf32> to vector<16x16xf32>
    %33 = vector.shape_cast %30 : vector<16x16xf32> to vector<1x1x16x16xf32>
    tpu.vector_store %arg6[%c0_11, %c0_12, %c0_13, %c0_14], %33 {strides = array<i32>} : memref<1x4x16x16xf32, #tpu.memory_space<vmem>>, vector<1x1x16x16xf32>,
    %34 = vector.extract_strided_slice %28 {offsets = [1, 0, 0], sizes = [1, 16, 16], strides = [1, 1, 1]} : vector<4x16x16xf32> to vector<1x16x16xf32>
    %35 = vector.shape_cast %34 : vector<1x16x16xf32> to vector<16x16xf32>
    %c0_15 = arith.constant 0 : index
    %c1 = arith.constant 1 : index
    %c0_16 = arith.constant 0 : index
    %c0_17 = arith.constant 0 : index
    %36 = vector.load %arg6[%c0_15, %c1, %c0_16, %c0_17] : memref<1x4x16x16xf32, #tpu.memory_space<vmem>>, vector<1x1x16x16xf32>
    %37 = vector.shape_cast %36 : vector<1x1x16x16xf32> to vector<16x16xf32>
    %38 = vector.shape_cast %35 : vector<16x16xf32> to vector<1x1x16x16xf32>
    tpu.vector_store %arg6[%c0_15, %c1, %c0_16, %c0_17], %38 {strides = array<i32>} : memref<1x4x16x16xf32, #tpu.memory_space<vmem>>, vector<1x1x16x16xf32>,
    %39 = vector.extract_strided_slice %28 {offsets = [2, 0, 0], sizes = [1, 16, 16], strides = [1, 1, 1]} : vector<4x16x16xf32> to vector<1x16x16xf32>
    %40 = vector.shape_cast %39 : vector<1x16x16xf32> to vector<16x16xf32>
    %c0_18 = arith.constant 0 : index
    %c2 = arith.constant 2 : index
    %c0_19 = arith.constant 0 : index
    %c0_20 = arith.constant 0 : index
    %41 = vector.load %arg6[%c0_18, %c2, %c0_19, %c0_20] : memref<1x4x16x16xf32, #tpu.memory_space<vmem>>, vector<1x1x16x16xf32>
    %42 = vector.shape_cast %41 : vector<1x1x16x16xf32> to vector<16x16xf32>
    %43 = vector.shape_cast %40 : vector<16x16xf32> to vector<1x1x16x16xf32>
    tpu.vector_store %arg6[%c0_18, %c2, %c0_19, %c0_20], %43 {strides = array<i32>} : memref<1x4x16x16xf32, #tpu.memory_space<vmem>>, vector<1x1x16x16xf32>,
    %44 = vector.extract_strided_slice %28 {offsets = [3, 0, 0], sizes = [1, 16, 16], strides = [1, 1, 1]} : vector<4x16x16xf32> to vector<1x16x16xf32>
    %45 = vector.shape_cast %44 : vector<1x16x16xf32> to vector<16x16xf32>
    %c0_21 = arith.constant 0 : index
    %c3 = arith.constant 3 : index
    %c0_22 = arith.constant 0 : index
    %c0_23 = arith.constant 0 : index
    %46 = vector.load %arg6[%c0_21, %c3, %c0_22, %c0_23] : memref<1x4x16x16xf32, #tpu.memory_space<vmem>>, vector<1x1x16x16xf32>
    %47 = vector.shape_cast %46 : vector<1x1x16x16xf32> to vector<16x16xf32>
    %48 = vector.shape_cast %45 : vector<16x16xf32> to vector<1x1x16x16xf32>
    tpu.vector_store %arg6[%c0_21, %c3, %c0_22, %c0_23], %48 {strides = array<i32>} : memref<1x4x16x16xf32, #tpu.memory_space<vmem>>, vector<1x1x16x16xf32>,
    return
  }
  func.func @transform_0(%arg0: i32, %arg1: i32, %arg2: i32) -> (i32, i32) {
    %c0_i32 = arith.constant 0 : i32
    %c0_i32_0 = arith.constant 0 : i32
    %c0_i32_1 = arith.constant 0 : i32
    return %c0_i32, %c0_i32_0 : i32, i32
  }
  func.func @transform_1(%arg0: i32, %arg1: i32, %arg2: i32) -> (i32, i32) {
    %c0_i32 = arith.constant 0 : i32
    %c0_i32_0 = arith.constant 0 : i32
    %c0_i32_1 = arith.constant 0 : i32
    return %c0_i32, %c0_i32_0 : i32, i32
  }
  func.func @transform_2(%arg0: i32, %arg1: i32, %arg2: i32) -> (i32, i32, i32, i32) {
    %c0_i32 = arith.constant 0 : i32
    %c0_i32_0 = arith.constant 0 : i32
    %c0_i32_1 = arith.constant 0 : i32
    return %arg0, %arg1, %c0_i32, %c0_i32_0 : i32, i32, i32, i32
  }
  func.func @transform_3(%arg0: i32, %arg1: i32, %arg2: i32) -> (i32, i32, i32, i32) {
    %c0_i32 = arith.constant 0 : i32
    %c0_i32_0 = arith.constant 0 : i32
    %c0_i32_1 = arith.constant 0 : i32
    return %arg0, %arg1, %c0_i32, %c0_i32_0 : i32, i32, i32, i32
  }
}

module attributes {stable_mosaic.version = 11 : i64} {
  func.func @_resize_pad_kernel(%arg0: i32, %arg1: i32, %arg2: i32, %arg3: memref<16x32xbf16, #tpu.memory_space<vmem>>, %arg4: memref<24x16xbf16, #tpu.memory_space<vmem>>, %arg5: memref<1x4x32x24xf32, #tpu.memory_space<vmem>>, %arg6: memref<1x4x16x16xf32, #tpu.memory_space<vmem>>) attributes {dimension_semantics = [#tpu.dimension_semantics<parallel>, #tpu.dimension_semantics<parallel>, #tpu.dimension_semantics<arbitrary>], iteration_bounds = array<i64: 2, 1, 1>, scalar_prefetch = 0 : i64, scratch_operands = 0 : i64, tpu.core_type = #tpu.core_type<tc>, window_params = [{pipeline_mode = #tpu.pipeline_mode<synchronous>, transform_indices = @transform_0, window_bounds = array<i64: 16, 32>}, {pipeline_mode = #tpu.pipeline_mode<synchronous>, transform_indices = @transform_1, window_bounds = array<i64: 24, 16>}, {transform_indices = @transform_2, window_bounds = array<i64: 1, 4, 32, 24>}, {transform_indices = @transform_3, window_bounds = array<i64: 1, 4, 16, 16>}]} {
    %c0 = arith.constant 0 : index
    %c0_0 = arith.constant 0 : index
    %0 = vector.load %arg3[%c0, %c0_0] : memref<16x32xbf16, #tpu.memory_space<vmem>>, vector<16x32xbf16>
    %c0_1 = arith.constant 0 : index
    %c0_2 = arith.constant 0 : index
    %1 = vector.load %arg4[%c0_1, %c0_2] : memref<24x16xbf16, #tpu.memory_space<vmem>>, vector<24x16xbf16>
    %c0_3 = arith.constant 0 : index
    %c0_4 = arith.constant 0 : index
    %c0_5 = arith.constant 0 : index
    %c0_6 = arith.constant 0 : index
    %2 = vector.load %arg5[%c0_3, %c0_4, %c0_5, %c0_6] : memref<1x4x32x24xf32, #tpu.memory_space<vmem>>, vector<1x4x32x24xf32>
    %3 = vector.shape_cast %2 : vector<1x4x32x24xf32> to vector<4x32x24xf32>
    %4 = arith.truncf %3 : vector<4x32x24xf32> to vector<4x32x24xbf16>
    %5 = vector.extract_strided_slice %4 {offsets = [0, 0, 0], sizes = [1, 32, 24], strides = [1, 1, 1]} : vector<4x32x24xbf16> to vector<1x32x24xbf16>
    %6 = vector.shape_cast %5 : vector<1x32x24xbf16> to vector<32x24xbf16>
    %cst = arith.constant dense<0.000000e+00> : vector<16x24xf32>
    %7 = tpu.matmul %0, %6, %cst {dimension_numbers = #tpu.dot_dimension_numbers<[1], [0], [0], [1], [0, 0, 1, 1], [], []>} : vector<16x32xbf16>, vector<32x24xbf16>, vector<16x24xf32> -> vector<16x24xf32>
    %8 = arith.truncf %7 : vector<16x24xf32> to vector<16x24xbf16>
    %9 = vector.extract_strided_slice %4 {offsets = [1, 0, 0], sizes = [1, 32, 24], strides = [1, 1, 1]} : vector<4x32x24xbf16> to vector<1x32x24xbf16>
    %10 = vector.shape_cast %9 : vector<1x32x24xbf16> to vector<32x24xbf16>
    %cst_7 = arith.constant dense<0.000000e+00> : vector<16x24xf32>
    %11 = tpu.matmul %0, %10, %cst_7 {dimension_numbers = #tpu.dot_dimension_numbers<[1], [0], [0], [1], [0, 0, 1, 1], [], []>} : vector<16x32xbf16>, vector<32x24xbf16>, vector<16x24xf32> -> vector<16x24xf32>
    %12 = arith.truncf %11 : vector<16x24xf32> to vector<16x24xbf16>
    %13 = vector.extract_strided_slice %4 {offsets = [2, 0, 0], sizes = [1, 32, 24], strides = [1, 1, 1]} : vector<4x32x24xbf16> to vector<1x32x24xbf16>
    %14 = vector.shape_cast %13 : vector<1x32x24xbf16> to vector<32x24xbf16>
    %cst_8 = arith.constant dense<0.000000e+00> : vector<16x24xf32>
    %15 = tpu.matmul %0, %14, %cst_8 {dimension_numbers = #tpu.dot_dimension_numbers<[1], [0], [0], [1], [0, 0, 1, 1], [], []>} : vector<16x32xbf16>, vector<32x24xbf16>, vector<16x24xf32> -> vector<16x24xf32>
    %16 = arith.truncf %15 : vector<16x24xf32> to vector<16x24xbf16>
    %17 = vector.extract_strided_slice %4 {offsets = [3, 0, 0], sizes = [1, 32, 24], strides = [1, 1, 1]} : vector<4x32x24xbf16> to vector<1x32x24xbf16>
    %18 = vector.shape_cast %17 : vector<1x32x24xbf16> to vector<32x24xbf16>
    %cst_9 = arith.constant dense<0.000000e+00> : vector<16x24xf32>
    %19 = tpu.matmul %0, %18, %cst_9 {dimension_numbers = #tpu.dot_dimension_numbers<[1], [0], [0], [1], [0, 0, 1, 1], [], []>} : vector<16x32xbf16>, vector<32x24xbf16>, vector<16x24xf32> -> vector<16x24xf32>
    %20 = arith.truncf %19 : vector<16x24xf32> to vector<16x24xbf16>
    %21 = vector.shape_cast %8 : vector<16x24xbf16> to vector<1x16x24xbf16>
    %22 = vector.shape_cast %12 : vector<16x24xbf16> to vector<1x16x24xbf16>
    %23 = vector.shape_cast %16 : vector<16x24xbf16> to vector<1x16x24xbf16>
    %24 = vector.shape_cast %20 : vector<16x24xbf16> to vector<1x16x24xbf16>
    %25 = tpu.concatenate %21, %22, %23, %24 in 0 : vector<1x16x24xbf16>, vector<1x16x24xbf16>, vector<1x16x24xbf16>, vector<1x16x24xbf16> -> vector<4x16x24xbf16>
    %26 = vector.shape_cast %25 : vector<4x16x24xbf16> to vector<64x24xbf16>
    %cst_10 = arith.constant dense<0.000000e+00> : vector<64x16xf32>
    %27 = tpu.matmul %26, %1, %cst_10 {dimension_numbers = #tpu.dot_dimension_numbers<[1], [0], [0], [1], [0, 0, 1, 1], [], []>} : vector<64x24xbf16>, vector<24x16xbf16>, vector<64x16xf32> -> vector<64x16xf32>
    %28 = vector.shape_cast %27 : vector<64x16xf32> to vector<4x16x16xf32>
    %29 = vector.extract_strided_slice %28 {offsets = [0, 0, 0], sizes = [1, 16, 16], strides = [1, 1, 1]} : vector<4x16x16xf32> to vector<1x16x16xf32>
    %30 = vector.shape_cast %29 : vector<1x16x16xf32> to vector<16x16xf32>
    %c0_11 = arith.constant 0 : index
    %c0_12 = arith.constant 0 : index
    %c0_13 = arith.constant 0 : index
    %c0_14 = arith.constant 0 : index
    %31 = vector.load %arg6[%c0_11, %c0_12, %c0_13, %c0_14] : memref<1x4x16x16xf32, #tpu.memory_space<vmem>>, vector<1x1x16x16xf32>
    %32 = vector.shape_cast %31 : vector<1x1x16x16xf32> to vector<16x16xf32>
    %33 = vector.shape_cast %30 : vector<16x16xf32> to vector<1x1x16x16xf32>
    tpu.vector_store %arg6[%c0_11, %c0_12, %c0_13, %c0_14], %33 {strides = array<i32>} : memref<1x4x16x16xf32, #tpu.memory_space<vmem>>, vector<1x1x16x16xf32>,
    %34 = vector.extract_strided_slice %28 {offsets = [1, 0, 0], sizes = [1, 16, 16], strides = [1, 1, 1]} : vector<4x16x16xf32> to vector<1x16x16xf32>
    %35 = vector.shape_cast %34 : vector<1x16x16xf32> to vector<16x16xf32>
    %c0_15 = arith.constant 0 : index
    %c1 = arith.constant 1 : index
    %c0_16 = arith.constant 0 : index
    %c0_17 = arith.constant 0 : index
    %36 = vector.load %arg6[%c0_15, %c1, %c0_16, %c0_17] : memref<1x4x16x16xf32, #tpu.memory_space<vmem>>, vector<1x1x16x16xf32>
    %37 = vector.shape_cast %36 : vector<1x1x16x16xf32> to vector<16x16xf32>
    %38 = vector.shape_cast %35 : vector<16x16xf32> to vector<1x1x16x16xf32>
    tpu.vector_store %arg6[%c0_15, %c1, %c0_16, %c0_17], %38 {strides = array<i32>} : memref<1x4x16x16xf32, #tpu.memory_space<vmem>>, vector<1x1x16x16xf32>,
    %39 = vector.extract_strided_slice %28 {offsets = [2, 0, 0], sizes = [1, 16, 16], strides = [1, 1, 1]} : vector<4x16x16xf32> to vector<1x16x16xf32>
    %40 = vector.shape_cast %39 : vector<1x16x16xf32> to vector<16x16xf32>
    %c0_18 = arith.constant 0 : index
    %c2 = arith.constant 2 : index
    %c0_19 = arith.constant 0 : index
    %c0_20 = arith.constant 0 : index
    %41 = vector.load %arg6[%c0_18, %c2, %c0_19, %c0_20] : memref<1x4x16x16xf32, #tpu.memory_space<vmem>>, vector<1x1x16x16xf32>
    %42 = vector.shape_cast %41 : vector<1x1x16x16xf32> to vector<16x16xf32>
    %43 = vector.shape_cast %40 : vector<16x16xf32> to vector<1x1x16x16xf32>
    tpu.vector_store %arg6[%c0_18, %c2, %c0_19, %c0_20], %43 {strides = array<i32>} : memref<1x4x16x16xf32, #tpu.memory_space<vmem>>, vector<1x1x16x16xf32>,
    %44 = vector.extract_strided_slice %28 {offsets = [3, 0, 0], sizes = [1, 16, 16], strides = [1, 1, 1]} : vector<4x16x16xf32> to vector<1x16x16xf32>
    %45 = vector.shape_cast %44 : vector<1x16x16xf32> to vector<16x16xf32>
    %c0_21 = arith.constant 0 : index
    %c3 = arith.constant 3 : index
    %c0_22 = arith.constant 0 : index
    %c0_23 = arith.constant 0 : index
    %46 = vector.load %arg6[%c0_21, %c3, %c0_22, %c0_23] : memref<1x4x16x16xf32, #tpu.memory_space<vmem>>, vector<1x1x16x16xf32>
    %47 = vector.shape_cast %46 : vector<1x1x16x16xf32> to vector<16x16xf32>
    %48 = vector.shape_cast %45 : vector<16x16xf32> to vector<1x1x16x16xf32>
    tpu.vector_store %arg6[%c0_21, %c3, %c0_22, %c0_23], %48 {strides = array<i32>} : memref<1x4x16x16xf32, #tpu.memory_space<vmem>>, vector<1x1x16x16xf32>,
    return
  }
  func.func @transform_0(%arg0: i32, %arg1: i32, %arg2: i32) -> (i32, i32) {
    %c0_i32 = arith.constant 0 : i32
    %c0_i32_0 = arith.constant 0 : i32
    %c0_i32_1 = arith.constant 0 : i32
    return %c0_i32, %c0_i32_0 : i32, i32
  }
  func.func @transform_1(%arg0: i32, %arg1: i32, %arg2: i32) -> (i32, i32) {
    %c0_i32 = arith.constant 0 : i32
    %c0_i32_0 = arith.constant 0 : i32
    %c0_i32_1 = arith.constant 0 : i32
    return %c0_i32, %c0_i32_0 : i32, i32
  }
  func.func @transform_2(%arg0: i32, %arg1: i32, %arg2: i32) -> (i32, i32, i32, i32) {
    %c0_i32 = arith.constant 0 : i32
    %c0_i32_0 = arith.constant 0 : i32
    %c0_i32_1 = arith.constant 0 : i32
    return %arg0, %arg1, %c0_i32, %c0_i32_0 : i32, i32, i32, i32
  }
  func.func @transform_3(%arg0: i32, %arg1: i32, %arg2: i32) -> (i32, i32, i32, i32) {
    %c0_i32 = arith.constant 0 : i32
    %c0_i32_0 = arith.constant 0 : i32
    %c0_i32_1 = arith.constant 0 : i32
    return %arg0, %arg1, %c0_i32, %c0_i32_0 : i32, i32, i32, i32
  }
}

</mosaic_0001>

<bundles_post_ra>
// kernel: tpu_custom_call.1
= control target key start
LH: loop header
LB: loop body
LE: loop exit
PB: predicated region body
PF: predicated region fallthrough
CT: control target
= control target key end

     0   :  { %8 = vsyncpa [#allocation3], 0  ;;  %s893_s0 = inlined_call_operand.vmem [shape: bf16[16,32], index: 0, kind: input, shape index: {}]   ;;  %s894_s1 = inlined_call_operand.vmem [shape: bf16[24,16], index: 1, kind: input, shape index: {}]   ;;  %s895_s2 = inlined_call_operand.vmem [shape: f32[2,4,32,24], index: 2, kind: input, shape index: {}]   ;;  %s896_s3 = inlined_call_operand.hbm [shape: f32[2,4,16,16], index: 3, kind: output, shape index: {}]  }
   0x1   :  { %10 = vsyncpa [#allocation3 + $0x1], 0  ;;  %s757_s12 = smov 0   ;;  %s759_s13 = smov 0  }
   0x2   :  { %s761_s14 = smov 0   ;;  %s763_s15 = smov 0  }
   0x3   :  { %s765_s16 = smov 0   ;;  %s767_s17 = smov 0  }
   0x4 LB: > { %s557_s18 = sadd.s32 4294967295, %s733_s17   ;;  %s558_s19 = sadd.s32 4294967294, %s733_s17   ;;  %s733_s17 = sphi %s767_s17, %s16_s17   ;;  %s729_s16 = sphi %s765_s16, %s903_s16   ;;  %s725_s15 = sphi %s763_s15, %s902_s15   ;;  %s721_s14 = sphi %s761_s14, %s901_s14   ;;  %s717_s13 = sphi %s759_s13, %s900_s13   ;;  %s713_s12 = sphi %s757_s12, %s899_s12  }
   0x5   : > { %s35_s20 = sadd.s32 1, %s729_s16  ;;  %s114_s21 = sadd.s32 1, %s721_s14 }
   0x6   : > { %p37_p0 = scmp.ge.s32.totalorder %s35_s20, 2  ;;  %p124_p1 = scmp.ne.s32.totalorder %s721_s14, %s717_s13 }
   0x7   : > { %p125_p2 = scmp.eq.s32.totalorder %s557_s18, 1  ;;  %p130_p3 = scmp.ne.s32.totalorder %s717_s13, %s713_s12 }
   0x8   : > { %s905_s20 = smov (%p37_p0, %s35_s20), 0  ;;  %p131_p5 = scmp.eq.s32.totalorder %s558_s19, 1 }
   0x9   : > { %p797_p4 = por %p125_p2, %p124_p1  ;;  %s109_s23 = ssub.s32 %s729_s16, %s905_s20 }
   0xa   : > { %p561_p6 = scmp.ge.s32.totalorder %s733_s17, 1  ;;  %p112_p7 = scmp.eq.s32.totalorder %s109_s23, 0 }
   0xb   : > { %p804_p8 = por %p131_p5, %p130_p3  ;;  %p169_p9 = scmp.lt.s32.totalorder %s733_s17, 3 }
   0xc   : > { %s810_s25 = scalar_select %p112_p7, %s721_s14, %s114_s21  }
   0xd   : > { %p170_p10 = pnand %p561_p6, %p169_p9 }
   0xe   : > { %p199_p11 = scmp.lt.s32.totalorder (!%p170_p10), %s725_s15, 1  ;;  %s195_s10 = sand.u32 (!%p170_p10), 1, %s717_s13  }
   0xf   : > { %173 = sbr.rel (%p170_p10) target bundleno = 345 (0x159), region = 32  ;;  %s562_s11 = sshll.u32 (!%p170_p10), %s195_s10, 6 }
  0x10   : > { %s197_s18 = scalar_lea.vmem (!%p170_p10), [#allocation2], %s562_s11  ;;  %s595_s19 = sshll.u32 (!%p170_p10), %s725_s15, 6 }
  0x11   : > { %s457_s29 = scalar_lea.sflag (!%p170_p10), [#allocation3], %s195_s10  ;;  %s675_s6 = scalar_lea.hbm (!%p170_p10), %s896_s3, 128 }
  0x14   : > { %s200_s26 = scalar_select %p199_p11, %s725_s15, 1  ;;  %v593_v50 = vld [vmem:[%s893_s0] sm:$0xff]  ;;  %vm265_vm0 = vcmask 261120   ;;  %v215_v57 = vld [vmem:[%s894_s1 + $0x8] sm:$0xf]  ;;  %vm411_vm1 = vcmask 1043456  }
  0x15   : > { %v394_v58 = vunpack.c.l.b16 %v215_v57  ;;  %v594_v61 = vld [vmem:[%s894_s1] sm:$0xff]  ;;  %vm398_vm2 = vcmask 195584   ;;  %vm444_vm3 = vcmask 130048  }
  0x16   : > { %s592_s27 = sshll.u32 %s200_s26, 7  ;;  %s471_s26 = scalar_lea.hbm %s896_s3, %s595_s19 }
  0x17   : > { %s817_s30 = scalar_lea.vmem %s895_s2, %s592_s27  ;;  %v396_v59 = vpack.c.b16 %v394_v58, %v394_v58  ;;  %s472_s27 = sshll.u32 %s197_s18, 4  ;;  %s473_s27 = int_to_ptr.vmem [resolvable:$true] %s472_s27 }
  0x18   : > { %v218_v0 = vld [vmem:[%s817_s30 + $0x10] sm:$0xff]  ;;  %v219_v1 = vld [vmem:[%s817_s30 + $0x18] sm:$0xff]  ;;  %v216_v7 = vld [vmem:[%s817_s30] sm:$0xff]  ;;  %s474_s28 = sshll.u32 %s471_s26, 4  ;;  %s475_s28 = int_to_ptr.hbm [resolvable:$true] %s474_s28 }
  0x19   : > { %v226_v2 = vld [vmem:[%s817_s30 + $0x50] sm:$0xff]  ;;  %v234_v3 = vpack.c.bf16 %v218_v0, %v218_v0  ;;  %v235_v4 = vpack.c.bf16 %v219_v1, %v219_v1  ;;  %v227_v5 = vld [vmem:[%s817_s30 + $0x58] sm:$0xff]  ;;  %v217_v8 = vld [vmem:[%s817_s30 + $0x8] sm:$0xff]  ;;  %v232_v10 = vpack.c.bf16 %v216_v7, %v216_v7  ;;  %v413_v60 = vsel %vm411_vm1, %v396_v59, 0 }
  0x1a   : > { %v242_v6 = vpack.c.bf16 %v226_v2, %v226_v2  ;;  %v243_v9 = vpack.c.bf16 %v227_v5, %v227_v5  ;;  %v233_v11 = vpack.c.bf16 %v217_v8, %v217_v8  ;;  %v224_v12 = vld [vmem:[%s817_s30 + $0x40] sm:$0xff]  ;;  %v225_v13 = vld [vmem:[%s817_s30 + $0x48] sm:$0xff]  ;;  %v230_v14 = vld [vmem:[%s817_s30 + $0x70] sm:$0xff]  ;;  %421 = vmatpush.bf16.msra.mxu0 %v413_v60  ;;  %596 = vmatpush.bf16.msra.mxu2 %v413_v60 }
  0x1b   : > { %v259_v15 = vunpack.c.l.b16 %v234_v3  ;;  %v260_v16 = vunpack.c.l.b16 %v235_v4  ;;  %v240_v18 = vpack.c.bf16 %v224_v12, %v224_v12  ;;  %v231_v19 = vld [vmem:[%s817_s30 + $0x78] sm:$0xff]  ;;  %v228_v20 = vld [vmem:[%s817_s30 + $0x60] sm:$0xff]  ;;  %v257_v22 = vunpack.c.l.b16 %v232_v10  ;;  %v229_v25 = vld [vmem:[%s817_s30 + $0x68] sm:$0xff] }
  0x1c   : > { %v319_v17 = vunpack.c.l.b16 %v242_v6  ;;  %v320_v21 = vunpack.c.l.b16 %v243_v9  ;;  %v258_v23 = vunpack.c.l.b16 %v233_v11  ;;  %v241_v24 = vpack.c.bf16 %v225_v13, %v225_v13  ;;  %v222_v26 = vld [vmem:[%s817_s30 + $0x30] sm:$0xff]  ;;  %v223_v31 = vld [vmem:[%s817_s30 + $0x38] sm:$0xff]  ;;  %v220_v32 = vld [vmem:[%s817_s30 + $0x20] sm:$0xff] }
  0x1d   : > { %v262_v27 = vpack.c.b16 %v260_v16, %v259_v15  ;;  %v317_v28 = vunpack.c.l.b16 %v240_v18  ;;  %v246_v29 = vpack.c.bf16 %v230_v14, %v230_v14  ;;  %v247_v30 = vpack.c.bf16 %v231_v19, %v231_v19  ;;  %v221_v37 = vld [vmem:[%s817_s30 + $0x28] sm:$0xff]  ;;  %s669_s30 = sshra.s32 %s475_s28, 4  ;;  %s670_s30 = int_to_ptr.hbm [resolvable:$true] %s669_s30 }
  0x1e   : > { %v322_v33 = vpack.c.b16 %v320_v21, %v319_v17  ;;  %v261_v34 = vpack.c.b16 %v258_v23, %v257_v22  ;;  %v318_v35 = vunpack.c.l.b16 %v241_v24  ;;  %v244_v36 = vpack.c.bf16 %v228_v20, %v228_v20  ;;  %422 = vmatpush.bf16.msra.mxu0 %v594_v61  ;;  %597 = vmatpush.bf16.msra.mxu2 %v594_v61  ;;  %s671_s4 = scalar_lea.hbm %s670_s30, 64  ;;  %p676_p1 = scmp.lt.s32.totalorder %s670_s30, %s896_s3 }
  0x1f   : > { %275 = vmatpush.bf16.msra.mxu1 %v262_v27  ;;  %v347_v38 = vunpack.c.l.b16 %v246_v29  ;;  %v348_v39 = vunpack.c.l.b16 %v247_v30  ;;  %v245_v40 = vpack.c.bf16 %v229_v25, %v229_v25  ;;  %v238_v41 = vpack.c.bf16 %v222_v26, %v222_v26  ;;  %p672_p12 = scmp.ne.s32.totalorder %s670_s30, %s671_s4  ;;  %p677_p2 = scmp.lt.s32.totalorder %s675_s6, %s671_s4 }
  0x20   : > { %331 = vmatpush.bf16.msra.mxu3 %v322_v33  ;;  %v321_v42 = vpack.c.b16 %v318_v35, %v317_v28  ;;  %v345_v43 = vunpack.c.l.b16 %v244_v36  ;;  %v239_v44 = vpack.c.bf16 %v223_v31, %v223_v31  ;;  %v236_v45 = vpack.c.bf16 %v220_v32, %v220_v32 }
  0x21   : > { %v350_v46 = vpack.c.b16 %v348_v39, %v347_v38  ;;  %v346_v47 = vunpack.c.l.b16 %v245_v40  ;;  %v291_v48 = vunpack.c.l.b16 %v238_v41  ;;  %v237_v49 = vpack.c.bf16 %v221_v37, %v221_v37  ;;  %p673_p13 = pnand %p672_p12, %p797_p4  ;;  %p678_p3 = por %p677_p2, %p676_p1 }
  0x22   : > { %v292_v51 = vunpack.c.l.b16 %v239_v44  ;;  %v289_v52 = vunpack.c.l.b16 %v236_v45 }
  0x23   : > { %276 = vmatpush.bf16.msra.mxu1 %v261_v34  ;;  %v290_v53 = vunpack.c.l.b16 %v237_v49  ;;  %v349_v55 = vpack.c.b16 %v346_v47, %v345_v43  ;;  %p674_p0 = pneg %p673_p13 }
  0x24   : > { %332 = vmatpush.bf16.msra.mxu3 %v321_v42  ;;  %v294_v54 = vpack.c.b16 %v292_v51, %v291_v48 }
  0x25   : > { %v293_v56 = vpack.c.b16 %v290_v53, %v289_v52  ;;  %p679_p5 = pnand %p678_p3, %p674_p0 }
  0x26   : > { %569 = vmatmul.msk.bf16.vlgmr.msra.gmra.mxu1 %vm265_vm0, %v593_v50 }
  0x27   : > { %571 = vmatmul.msk.bf16.vlgmr.msra.gmra.mxu3 %vm265_vm0, %v593_v50  ;;  %303 = vmatpush.bf16.msrb.mxu1 %v294_v54 }
  0x28   : > { %359 = vmatpush.bf16.msrb.mxu3 %v350_v46 }
  0x2b   : > { %304 = vmatpush.bf16.msrb.mxu1 %v293_v56 }
  0x2c   : > { %360 = vmatpush.bf16.msrb.mxu3 %v349_v55 }
  0x36   : > { %570 = vmatmul.msk.bf16.vlgmr.msrb.gmra.mxu1 %vm265_vm0, %v593_v50 }
  0x37   : > { %572 = vmatmul.msk.bf16.vlgmr.msrb.gmra.mxu3 %vm265_vm0, %v593_v50 }
  0xa3   : > { %v278_v62 = vpop.f32.mrf.mxu1 }
  0xa4   : > { %v283_v63 = vpack.c.bf16 %v278_v62, %v278_v62 }
  0xa6   : > { %v377_v2 = vunpack.c.l.b16 %v283_v63 }
  0xaa   : > { %v334_v0 = vpop.f32.mrf.mxu3 }
  0xab   : > { %v280_v1 = vpop.f32.mrf.mxu1  ;;  %v339_v6 = vpack.c.bf16 %v334_v0, %v334_v0 }
  0xac   : > { %v284_v3 = vpack.c.bf16 %v280_v1, %v280_v1 }
  0xad   : > { %v381_v10 = vunpack.c.l.b16 %v339_v6 }
  0xae   : > { %v378_v4 = vunpack.c.l.b16 %v284_v3 }
  0xb0   : > { %v385_v5 = vpack.c.b16 %v378_v4, %v377_v2 }
  0xb2   : > { %v336_v7 = vpop.f32.mrf.mxu3  ;;  %577 = vmatmul.msk.bf16.vlgmr.msra.gmra.mxu0 %vm398_vm2, %v385_v5 }
  0xb3   : > { %v340_v8 = vpack.c.bf16 %v336_v7, %v336_v7  ;;  %v306_v9 = vpop.f32.mrf.mxu1 }
  0xb4   : > { %v311_v13 = vpack.c.bf16 %v306_v9, %v306_v9 }
  0xb5   : > { %v382_v11 = vunpack.c.l.b16 %v340_v8 }
  0xb6   : > { %v379_v16 = vunpack.c.l.b16 %v311_v13 }
  0xb7   : > { %v387_v12 = vpack.c.b16 %v382_v11, %v381_v10 }
  0xb9   : > { %579 = vmatmul.msk.bf16.vlgmr.msra.gmra.mxu2 %vm398_vm2, %v387_v12 }
  0xba   : > { %v362_v14 = vpop.f32.mrf.mxu3 }
  0xbb   : > { %v308_v15 = vpop.f32.mrf.mxu1  ;;  %v367_v20 = vpack.c.bf16 %v362_v14, %v362_v14 }
  0xbc   : > { %v312_v17 = vpack.c.bf16 %v308_v15, %v308_v15 }
  0xbd   : > { %v383_v23 = vunpack.c.l.b16 %v367_v20 }
  0xbe   : > { %v380_v18 = vunpack.c.l.b16 %v312_v17 }
  0xc0   : > { %v386_v19 = vpack.c.b16 %v380_v18, %v379_v16 }
  0xc2   : > { %v364_v21 = vpop.f32.mrf.mxu3  ;;  %578 = vmatmul.msk.bf16.gmra.mxu0 %vm398_vm2, %v386_v19 }
  0xc3   : > { %v368_v22 = vpack.c.bf16 %v364_v21, %v364_v21 }
  0xc5   : > { %v384_v24 = vunpack.c.l.b16 %v368_v22 }
  0xc7   : > { %v388_v25 = vpack.c.b16 %v384_v24, %v383_v23 }
  0xc9   : > { %580 = vmatmul.msk.bf16.gmra.mxu2 %vm398_vm2, %v388_v25 }
 0x12f   : > { %v424_v26 = vpop.f32.mrf.mxu0 }
 0x130   : > { %445 = vst.msk [vmem:[%s197_s18] sm:$0xff] %vm444_vm3, %v424_v26 }
 0x137   : > { %v426_v27 = vpop.f32.mrf.mxu0 }
 0x138   : > { %446 = vst.msk [vmem:[%s197_s18 + $0x8] sm:$0xff] %vm444_vm3, %v426_v27 }
 0x13c   : > { %v434_v28 = vpop.f32.mrf.mxu2 }
 0x13d   : > { %583 = vst.msk [vmem:[%s197_s18 + $0x20] sm:$0xff] %vm444_vm3, %v434_v28 }
 0x13f   : > { %v429_v29 = vpop.f32.mrf.mxu0 }
 0x140   : > { %581 = vst.msk [vmem:[%s197_s18 + $0x10] sm:$0xff] %vm444_vm3, %v429_v29 }
 0x144   : > { %v436_v30 = vpop.f32.mrf.mxu2 }
 0x145   : > { %584 = vst.msk [vmem:[%s197_s18 + $0x28] sm:$0xff] %vm444_vm3, %v436_v30 }
 0x147   : > { %v431_v31 = vpop.f32.mrf.mxu0 }
 0x148   : > { %582 = vst.msk [vmem:[%s197_s18 + $0x18] sm:$0xff] %vm444_vm3, %v431_v31 }
 0x14c   : > { %v439_v32 = vpop.f32.mrf.mxu2 }
 0x14d   : > { %585 = vst.msk [vmem:[%s197_s18 + $0x30] sm:$0xff] %vm444_vm3, %v439_v32 }
 0x154   : > { %v441_v33 = vpop.f32.mrf.mxu2 }
 0x155   : > { %586 = vst.msk [vmem:[%s197_s18 + $0x38] sm:$0xff] %vm444_vm3, %v441_v33 }
 0x156   : > { %682 = shalt.err (!%p679_p5)
}
 0x157   : > { %s735_s9 = smov 128   ;;  %s736_s10 = smov 8  }
 0x158   : > { %598 = dma.vmem_to_hbm [thread:$0]  (%p797_p4), %s473_s27, 1024, %s475_s28, %s457_s29, %s735_s9, %s735_s9, %s736_s10  }
 0x159 PF: > { %p604_p6 = scmp.ge.s32.totalorder %s733_s17, 2  ;;  %s489_s11 = sand.u32 1, %s713_s12  }
 0x15a   : > { %s490_s18 = scalar_lea.sflag [#allocation3], %s489_s11 }
 0x15b   : > { %p601_p7 = pnand %p604_p6, %p804_p8 }
 0x15d   : > { %p602_p9 = pneg %p601_p7 }
 0x15f   : > { %708 = dma.done.wait (%p602_p9), %s490_s18, 1024  }
 0x160   : > { %710 = vsyncadd (%p602_p9), %s490_s18, 4294966272  ;;  %s16_s17 = sadd.s32 1, %s733_s17   ;;  %s899_s12 = smov %s717_s13 }
 0x161   : > { %p13_p10 = scmp.ge.s32.totalorder %s16_s17, 4   ;;  %s900_s13 = smov %s721_s14 }
 0x162   : > { %s901_s14 = smov %s810_s25  ;;  %s902_s15 = smov %s729_s16 }
 0x163   : > { %s903_s16 = smov %s905_s20  ;;  %15 = sbr.rel (!%p13_p10) target bundleno = 4 (0x4), region = 70 }
 0x168   :  { %496 = vsyncpa [#allocation3], 1 }
 0x169   :  { %498 = vsyncpa [#allocation3 + $0x1], 1 }

// kernel: tpu_custom_call.1
= control target key start
LH: loop header
LB: loop body
LE: loop exit
PB: predicated region body
PF: predicated region fallthrough
CT: control target
= control target key end

     0   :  { %8 = vsyncpa [#allocation3], 0  ;;  %s893_s0 = inlined_call_operand.vmem [shape: bf16[16,32], index: 0, kind: input, shape index: {}]   ;;  %s894_s1 = inlined_call_operand.vmem [shape: bf16[24,16], index: 1, kind: input, shape index: {}]   ;;  %s895_s2 = inlined_call_operand.vmem [shape: f32[2,4,32,24], index: 2, kind: input, shape index: {}]   ;;  %s896_s3 = inlined_call_operand.hbm [shape: f32[2,4,16,16], index: 3, kind: output, shape index: {}]  }
   0x1   :  { %10 = vsyncpa [#allocation3 + $0x1], 0  ;;  %s757_s12 = smov 0   ;;  %s759_s13 = smov 0  }
   0x2   :  { %s761_s14 = smov 0   ;;  %s763_s15 = smov 0  }
   0x3   :  { %s765_s16 = smov 0   ;;  %s767_s17 = smov 0  }
   0x4 LB: > { %s557_s18 = sadd.s32 4294967295, %s733_s17   ;;  %s558_s19 = sadd.s32 4294967294, %s733_s17   ;;  %s733_s17 = sphi %s767_s17, %s16_s17   ;;  %s729_s16 = sphi %s765_s16, %s903_s16   ;;  %s725_s15 = sphi %s763_s15, %s902_s15   ;;  %s721_s14 = sphi %s761_s14, %s901_s14   ;;  %s717_s13 = sphi %s759_s13, %s900_s13   ;;  %s713_s12 = sphi %s757_s12, %s899_s12  }
   0x5   : > { %s35_s20 = sadd.s32 1, %s729_s16  ;;  %s114_s21 = sadd.s32 1, %s721_s14 }
   0x6   : > { %p37_p0 = scmp.ge.s32.totalorder %s35_s20, 2  ;;  %p124_p1 = scmp.ne.s32.totalorder %s721_s14, %s717_s13 }
   0x7   : > { %p125_p2 = scmp.eq.s32.totalorder %s557_s18, 1  ;;  %p130_p3 = scmp.ne.s32.totalorder %s717_s13, %s713_s12 }
   0x8   : > { %s905_s20 = smov (%p37_p0, %s35_s20), 0  ;;  %p131_p5 = scmp.eq.s32.totalorder %s558_s19, 1 }
   0x9   : > { %p797_p4 = por %p125_p2, %p124_p1  ;;  %s109_s23 = ssub.s32 %s729_s16, %s905_s20 }
   0xa   : > { %p561_p6 = scmp.ge.s32.totalorder %s733_s17, 1  ;;  %p112_p7 = scmp.eq.s32.totalorder %s109_s23, 0 }
   0xb   : > { %p804_p8 = por %p131_p5, %p130_p3  ;;  %p169_p9 = scmp.lt.s32.totalorder %s733_s17, 3 }
   0xc   : > { %s810_s25 = scalar_select %p112_p7, %s721_s14, %s114_s21  }
   0xd   : > { %p170_p10 = pnand %p561_p6, %p169_p9 }
   0xe   : > { %p199_p11 = scmp.lt.s32.totalorder (!%p170_p10), %s725_s15, 1  ;;  %s195_s10 = sand.u32 (!%p170_p10), 1, %s717_s13  }
   0xf   : > { %173 = sbr.rel (%p170_p10) target bundleno = 345 (0x159), region = 32  ;;  %s562_s11 = sshll.u32 (!%p170_p10), %s195_s10, 6 }
  0x10   : > { %s197_s18 = scalar_lea.vmem (!%p170_p10), [#allocation2], %s562_s11  ;;  %s595_s19 = sshll.u32 (!%p170_p10), %s725_s15, 6 }
  0x11   : > { %s457_s29 = scalar_lea.sflag (!%p170_p10), [#allocation3], %s195_s10  ;;  %s675_s6 = scalar_lea.hbm (!%p170_p10), %s896_s3, 128 }
  0x14   : > { %s200_s26 = scalar_select %p199_p11, %s725_s15, 1  ;;  %v593_v50 = vld [vmem:[%s893_s0] sm:$0xff]  ;;  %vm265_vm0 = vcmask 261120   ;;  %v215_v57 = vld [vmem:[%s894_s1 + $0x8] sm:$0xf]  ;;  %vm411_vm1 = vcmask 1043456  }
  0x15   : > { %v394_v58 = vunpack.c.l.b16 %v215_v57  ;;  %v594_v61 = vld [vmem:[%s894_s1] sm:$0xff]  ;;  %vm398_vm2 = vcmask 195584   ;;  %vm444_vm3 = vcmask 130048  }
  0x16   : > { %s592_s27 = sshll.u32 %s200_s26, 7  ;;  %s471_s26 = scalar_lea.hbm %s896_s3, %s595_s19 }
  0x17   : > { %s817_s30 = scalar_lea.vmem %s895_s2, %s592_s27  ;;  %v396_v59 = vpack.c.b16 %v394_v58, %v394_v58  ;;  %s472_s27 = sshll.u32 %s197_s18, 4  ;;  %s473_s27 = int_to_ptr.vmem [resolvable:$true] %s472_s27 }
  0x18   : > { %v218_v0 = vld [vmem:[%s817_s30 + $0x10] sm:$0xff]  ;;  %v219_v1 = vld [vmem:[%s817_s30 + $0x18] sm:$0xff]  ;;  %v216_v7 = vld [vmem:[%s817_s30] sm:$0xff]  ;;  %s474_s28 = sshll.u32 %s471_s26, 4  ;;  %s475_s28 = int_to_ptr.hbm [resolvable:$true] %s474_s28 }
  0x19   : > { %v226_v2 = vld [vmem:[%s817_s30 + $0x50] sm:$0xff]  ;;  %v234_v3 = vpack.c.bf16 %v218_v0, %v218_v0  ;;  %v235_v4 = vpack.c.bf16 %v219_v1, %v219_v1  ;;  %v227_v5 = vld [vmem:[%s817_s30 + $0x58] sm:$0xff]  ;;  %v217_v8 = vld [vmem:[%s817_s30 + $0x8] sm:$0xff]  ;;  %v232_v10 = vpack.c.bf16 %v216_v7, %v216_v7  ;;  %v413_v60 = vsel %vm411_vm1, %v396_v59, 0 }
  0x1a   : > { %v242_v6 = vpack.c.bf16 %v226_v2, %v226_v2  ;;  %v243_v9 = vpack.c.bf16 %v227_v5, %v227_v5  ;;  %v233_v11 = vpack.c.bf16 %v217_v8, %v217_v8  ;;  %v224_v12 = vld [vmem:[%s817_s30 + $0x40] sm:$0xff]  ;;  %v225_v13 = vld [vmem:[%s817_s30 + $0x48] sm:$0xff]  ;;  %v230_v14 = vld [vmem:[%s817_s30 + $0x70] sm:$0xff]  ;;  %421 = vmatpush.bf16.msra.mxu0 %v413_v60  ;;  %596 = vmatpush.bf16.msra.mxu2 %v413_v60 }
  0x1b   : > { %v259_v15 = vunpack.c.l.b16 %v234_v3  ;;  %v260_v16 = vunpack.c.l.b16 %v235_v4  ;;  %v240_v18 = vpack.c.bf16 %v224_v12, %v224_v12  ;;  %v231_v19 = vld [vmem:[%s817_s30 + $0x78] sm:$0xff]  ;;  %v228_v20 = vld [vmem:[%s817_s30 + $0x60] sm:$0xff]  ;;  %v257_v22 = vunpack.c.l.b16 %v232_v10  ;;  %v229_v25 = vld [vmem:[%s817_s30 + $0x68] sm:$0xff] }
  0x1c   : > { %v319_v17 = vunpack.c.l.b16 %v242_v6  ;;  %v320_v21 = vunpack.c.l.b16 %v243_v9  ;;  %v258_v23 = vunpack.c.l.b16 %v233_v11  ;;  %v241_v24 = vpack.c.bf16 %v225_v13, %v225_v13  ;;  %v222_v26 = vld [vmem:[%s817_s30 + $0x30] sm:$0xff]  ;;  %v223_v31 = vld [vmem:[%s817_s30 + $0x38] sm:$0xff]  ;;  %v220_v32 = vld [vmem:[%s817_s30 + $0x20] sm:$0xff] }
  0x1d   : > { %v262_v27 = vpack.c.b16 %v260_v16, %v259_v15  ;;  %v317_v28 = vunpack.c.l.b16 %v240_v18  ;;  %v246_v29 = vpack.c.bf16 %v230_v14, %v230_v14  ;;  %v247_v30 = vpack.c.bf16 %v231_v19, %v231_v19  ;;  %v221_v37 = vld [vmem:[%s817_s30 + $0x28] sm:$0xff]  ;;  %s669_s30 = sshra.s32 %s475_s28, 4  ;;  %s670_s30 = int_to_ptr.hbm [resolvable:$true] %s669_s30 }
  0x1e   : > { %v322_v33 = vpack.c.b16 %v320_v21, %v319_v17  ;;  %v261_v34 = vpack.c.b16 %v258_v23, %v257_v22  ;;  %v318_v35 = vunpack.c.l.b16 %v241_v24  ;;  %v244_v36 = vpack.c.bf16 %v228_v20, %v228_v20  ;;  %422 = vmatpush.bf16.msra.mxu0 %v594_v61  ;;  %597 = vmatpush.bf16.msra.mxu2 %v594_v61  ;;  %s671_s4 = scalar_lea.hbm %s670_s30, 64  ;;  %p676_p1 = scmp.lt.s32.totalorder %s670_s30, %s896_s3 }
  0x1f   : > { %275 = vmatpush.bf16.msra.mxu1 %v262_v27  ;;  %v347_v38 = vunpack.c.l.b16 %v246_v29  ;;  %v348_v39 = vunpack.c.l.b16 %v247_v30  ;;  %v245_v40 = vpack.c.bf16 %v229_v25, %v229_v25  ;;  %v238_v41 = vpack.c.bf16 %v222_v26, %v222_v26  ;;  %p672_p12 = scmp.ne.s32.totalorder %s670_s30, %s671_s4  ;;  %p677_p2 = scmp.lt.s32.totalorder %s675_s6, %s671_s4 }
  0x20   : > { %331 = vmatpush.bf16.msra.mxu3 %v322_v33  ;;  %v321_v42 = vpack.c.b16 %v318_v35, %v317_v28  ;;  %v345_v43 = vunpack.c.l.b16 %v244_v36  ;;  %v239_v44 = vpack.c.bf16 %v223_v31, %v223_v31  ;;  %v236_v45 = vpack.c.bf16 %v220_v32, %v220_v32 }
  0x21   : > { %v350_v46 = vpack.c.b16 %v348_v39, %v347_v38  ;;  %v346_v47 = vunpack.c.l.b16 %v245_v40  ;;  %v291_v48 = vunpack.c.l.b16 %v238_v41  ;;  %v237_v49 = vpack.c.bf16 %v221_v37, %v221_v37  ;;  %p673_p13 = pnand %p672_p12, %p797_p4  ;;  %p678_p3 = por %p677_p2, %p676_p1 }
  0x22   : > { %v292_v51 = vunpack.c.l.b16 %v239_v44  ;;  %v289_v52 = vunpack.c.l.b16 %v236_v45 }
  0x23   : > { %276 = vmatpush.bf16.msra.mxu1 %v261_v34  ;;  %v290_v53 = vunpack.c.l.b16 %v237_v49  ;;  %v349_v55 = vpack.c.b16 %v346_v47, %v345_v43  ;;  %p674_p0 = pneg %p673_p13 }
  0x24   : > { %332 = vmatpush.bf16.msra.mxu3 %v321_v42  ;;  %v294_v54 = vpack.c.b16 %v292_v51, %v291_v48 }
  0x25   : > { %v293_v56 = vpack.c.b16 %v290_v53, %v289_v52  ;;  %p679_p5 = pnand %p678_p3, %p674_p0 }
  0x26   : > { %569 = vmatmul.msk.bf16.vlgmr.msra.gmra.mxu1 %vm265_vm0, %v593_v50 }
  0x27   : > { %571 = vmatmul.msk.bf16.vlgmr.msra.gmra.mxu3 %vm265_vm0, %v593_v50  ;;  %303 = vmatpush.bf16.msrb.mxu1 %v294_v54 }
  0x28   : > { %359 = vmatpush.bf16.msrb.mxu3 %v350_v46 }
  0x2b   : > { %304 = vmatpush.bf16.msrb.mxu1 %v293_v56 }
  0x2c   : > { %360 = vmatpush.bf16.msrb.mxu3 %v349_v55 }
  0x36   : > { %570 = vmatmul.msk.bf16.vlgmr.msrb.gmra.mxu1 %vm265_vm0, %v593_v50 }
  0x37   : > { %572 = vmatmul.msk.bf16.vlgmr.msrb.gmra.mxu3 %vm265_vm0, %v593_v50 }
  0xa3   : > { %v278_v62 = vpop.f32.mrf.mxu1 }
  0xa4   : > { %v283_v63 = vpack.c.bf16 %v278_v62, %v278_v62 }
  0xa6   : > { %v377_v2 = vunpack.c.l.b16 %v283_v63 }
  0xaa   : > { %v334_v0 = vpop.f32.mrf.mxu3 }
  0xab   : > { %v280_v1 = vpop.f32.mrf.mxu1  ;;  %v339_v6 = vpack.c.bf16 %v334_v0, %v334_v0 }
  0xac   : > { %v284_v3 = vpack.c.bf16 %v280_v1, %v280_v1 }
  0xad   : > { %v381_v10 = vunpack.c.l.b16 %v339_v6 }
  0xae   : > { %v378_v4 = vunpack.c.l.b16 %v284_v3 }
  0xb0   : > { %v385_v5 = vpack.c.b16 %v378_v4, %v377_v2 }
  0xb2   : > { %v336_v7 = vpop.f32.mrf.mxu3  ;;  %577 = vmatmul.msk.bf16.vlgmr.msra.gmra.mxu0 %vm398_vm2, %v385_v5 }
  0xb3   : > { %v340_v8 = vpack.c.bf16 %v336_v7, %v336_v7  ;;  %v306_v9 = vpop.f32.mrf.mxu1 }
  0xb4   : > { %v311_v13 = vpack.c.bf16 %v306_v9, %v306_v9 }
  0xb5   : > { %v382_v11 = vunpack.c.l.b16 %v340_v8 }
  0xb6   : > { %v379_v16 = vunpack.c.l.b16 %v311_v13 }
  0xb7   : > { %v387_v12 = vpack.c.b16 %v382_v11, %v381_v10 }
  0xb9   : > { %579 = vmatmul.msk.bf16.vlgmr.msra.gmra.mxu2 %vm398_vm2, %v387_v12 }
  0xba   : > { %v362_v14 = vpop.f32.mrf.mxu3 }
  0xbb   : > { %v308_v15 = vpop.f32.mrf.mxu1  ;;  %v367_v20 = vpack.c.bf16 %v362_v14, %v362_v14 }
  0xbc   : > { %v312_v17 = vpack.c.bf16 %v308_v15, %v308_v15 }
  0xbd   : > { %v383_v23 = vunpack.c.l.b16 %v367_v20 }
  0xbe   : > { %v380_v18 = vunpack.c.l.b16 %v312_v17 }
  0xc0   : > { %v386_v19 = vpack.c.b16 %v380_v18, %v379_v16 }
  0xc2   : > { %v364_v21 = vpop.f32.mrf.mxu3  ;;  %578 = vmatmul.msk.bf16.gmra.mxu0 %vm398_vm2, %v386_v19 }
  0xc3   : > { %v368_v22 = vpack.c.bf16 %v364_v21, %v364_v21 }
  0xc5   : > { %v384_v24 = vunpack.c.l.b16 %v368_v22 }
  0xc7   : > { %v388_v25 = vpack.c.b16 %v384_v24, %v383_v23 }
  0xc9   : > { %580 = vmatmul.msk.bf16.gmra.mxu2 %vm398_vm2, %v388_v25 }
 0x12f   : > { %v424_v26 = vpop.f32.mrf.mxu0 }
 0x130   : > { %445 = vst.msk [vmem:[%s197_s18] sm:$0xff] %vm444_vm3, %v424_v26 }
 0x137   : > { %v426_v27 = vpop.f32.mrf.mxu0 }
 0x138   : > { %446 = vst.msk [vmem:[%s197_s18 + $0x8] sm:$0xff] %vm444_vm3, %v426_v27 }
 0x13c   : > { %v434_v28 = vpop.f32.mrf.mxu2 }
 0x13d   : > { %583 = vst.msk [vmem:[%s197_s18 + $0x20] sm:$0xff] %vm444_vm3, %v434_v28 }
 0x13f   : > { %v429_v29 = vpop.f32.mrf.mxu0 }
 0x140   : > { %581 = vst.msk [vmem:[%s197_s18 + $0x10] sm:$0xff] %vm444_vm3, %v429_v29 }
 0x144   : > { %v436_v30 = vpop.f32.mrf.mxu2 }
 0x145   : > { %584 = vst.msk [vmem:[%s197_s18 + $0x28] sm:$0xff] %vm444_vm3, %v436_v30 }
 0x147   : > { %v431_v31 = vpop.f32.mrf.mxu0 }
 0x148   : > { %582 = vst.msk [vmem:[%s197_s18 + $0x18] sm:$0xff] %vm444_vm3, %v431_v31 }
 0x14c   : > { %v439_v32 = vpop.f32.mrf.mxu2 }
 0x14d   : > { %585 = vst.msk [vmem:[%s197_s18 + $0x30] sm:$0xff] %vm444_vm3, %v439_v32 }
 0x154   : > { %v441_v33 = vpop.f32.mrf.mxu2 }
 0x155   : > { %586 = vst.msk [vmem:[%s197_s18 + $0x38] sm:$0xff] %vm444_vm3, %v441_v33 }
 0x156   : > { %682 = shalt.err (!%p679_p5)
}
 0x157   : > { %s735_s9 = smov 128   ;;  %s736_s10 = smov 8  }
 0x158   : > { %598 = dma.vmem_to_hbm [thread:$0]  (%p797_p4), %s473_s27, 1024, %s475_s28, %s457_s29, %s735_s9, %s735_s9, %s736_s10  }
 0x159 PF: > { %p604_p6 = scmp.ge.s32.totalorder %s733_s17, 2  ;;  %s489_s11 = sand.u32 1, %s713_s12  }
 0x15a   : > { %s490_s18 = scalar_lea.sflag [#allocation3], %s489_s11 }
 0x15b   : > { %p601_p7 = pnand %p604_p6, %p804_p8 }
 0x15d   : > { %p602_p9 = pneg %p601_p7 }
 0x15f   : > { %708 = dma.done.wait (%p602_p9), %s490_s18, 1024  }
 0x160   : > { %710 = vsyncadd (%p602_p9), %s490_s18, 4294966272  ;;  %s16_s17 = sadd.s32 1, %s733_s17   ;;  %s899_s12 = smov %s717_s13 }
 0x161   : > { %p13_p10 = scmp.ge.s32.totalorder %s16_s17, 4   ;;  %s900_s13 = smov %s721_s14 }
 0x162   : > { %s901_s14 = smov %s810_s25  ;;  %s902_s15 = smov %s729_s16 }
 0x163   : > { %s903_s16 = smov %s905_s20  ;;  %15 = sbr.rel (!%p13_p10) target bundleno = 4 (0x4), region = 70 }
 0x168   :  { %496 = vsyncpa [#allocation3], 1 }
 0x169   :  { %498 = vsyncpa [#allocation3 + $0x1], 1 }

</bundles_post_ra>
